<compile_context>
chip_gen: v6e
topology: v6e:2x2x1
jax: 0.10.0
libtpu: 0.0.40
codegen_flags: <defaults>
</compile_context>

<pallas_src>
import functools

import jax
import jax.numpy as jnp
import numpy as np
from jax import lax
from jax.experimental import pallas as pl
from jax.experimental.pallas import tpu as pltpu

EPS = 1e-5
VMEM_LIMIT = 32 * 1024 * 1024   # safe on v5e/v6e (128 MiB) and v7x (64 MiB physical)


# ---------------------------------------------------------------------------
# Weight-side transform (computed once per call; "glue", not activation work)
# ---------------------------------------------------------------------------

def _band_weights(w_oihw, W):
    """OIHW 3x3 conv weights -> per-kh block-Toeplitz matrices (3, W*Cin, W*Cout).

    bw[kh, wi*Cin + ci, wo*Cout + co] = w[co, ci, kh, wi-wo+1] if 0 <= wi-wo+1 <= 2 else 0
    so that  out_kh[h, wo*Cout+co] = y[h+kh-1, :] @ bw[kh]
    implements the 3x3 'same' conv with zero padding in W folded into the weights.
    """
    Cout, Cin, KH, KW = w_oihw.shape
    w_hwio = jnp.transpose(w_oihw, (2, 3, 1, 0)).astype(jnp.float32)   # (kh, kw, Cin, Cout)
    wi = jnp.arange(W)[:, None]
    wo = jnp.arange(W)[None, :]
    kw = wi - wo + 1                                                   # (W, W)
    valid = (kw >= 0) & (kw <= KW - 1)
    kw_c = jnp.clip(kw, 0, KW - 1)
    blocks = w_hwio[:, kw_c]                                           # (KH, W, W, Cin, Cout)
    blocks = jnp.where(valid[None, :, :, None, None], blocks, 0.0)
    bw = blocks.transpose(0, 1, 3, 2, 4).reshape(KH, W * Cin, W * Cout)
    return bw


def _bn_affine_lane(sum_wc, sumsq_wc, gamma, beta, W, C, count):
    """Per-channel BN scale/bias from lane-dense (1, W*C) sums; broadcast back to (1, W*C)."""
    s_c = jnp.sum(sum_wc.reshape(W, C), axis=0)
    q_c = jnp.sum(sumsq_wc.reshape(W, C), axis=0)
    mean = s_c / count
    var = q_c / count - mean * mean                 # biased variance (PyTorch training BN)
    inv = lax.rsqrt(var + EPS)
    scale_c = gamma.astype(jnp.float32).reshape(C) * inv
    bias_c = beta.astype(jnp.float32).reshape(C) - mean * scale_c
    scale_wc = jnp.tile(scale_c, W).reshape(1, W * C)   # lane w*C+c -> scale_c[c]
    bias_wc = jnp.tile(bias_c, W).reshape(1, W * C)
    return scale_wc, bias_wc


def _pick_tb(N, H, WC, target_rows=512, max_block_bytes=4 << 20):
    """Samples per grid step: ~512 rows per block, bounded by VMEM, dividing N."""
    per_sample_bytes = H * WC * 4
    tb = max(1, min(N, max(1, target_rows // H),
                    max(1, max_block_bytes // per_sample_bytes)))
    while N % tb:
        tb -= 1
    return tb


# ---------------------------------------------------------------------------
# In-kernel helpers
# ---------------------------------------------------------------------------

def _conv3x3(y, bw_ref, H):
    """3x3 'same' conv on a (TB*H, W*Cin) f32 block.

    kw taps + Cin are folded into the MXU contraction (depth W*Cin) via the
    block-Toeplitz weights; kh taps come from sublane rolls (XLU) with
    per-sample boundary rows masked to zero (zero padding in H).
    """
    rows = y.shape[0]
    md = bw_ref.dtype
    hmod = lax.broadcasted_iota(jnp.int32, (rows, 1), 0) % H
    # y_dn[h] = y[h-1] (zero at h==0 of each sample); y_up[h] = y[h+1] (zero at h==H-1).
    y_dn = jnp.where(hmod != 0, pltpu.roll(y, shift=1, axis=0), 0.0)
    y_up = jnp.where(hmod != H - 1, pltpu.roll(y, shift=rows - 1, axis=0), 0.0)
    z = jnp.dot(y_dn.astype(md), bw_ref[0], preferred_element_type=jnp.float32)
    z = z + jnp.dot(y.astype(md), bw_ref[1], preferred_element_type=jnp.float32)
    z = z + jnp.dot(y_up.astype(md), bw_ref[2], preferred_element_type=jnp.float32)
    return z


# ---------------------------------------------------------------------------
# Kernels
# ---------------------------------------------------------------------------

def _stats_kernel(x_ref, sum_ref, sumsq_ref):
    """Pass 1: accumulate lane-dense (1, W*C) sum / sum-of-squares of x."""
    @pl.when(pl.program_id(0) == 0)
    def _init():
        sum_ref[...] = jnp.zeros_like(sum_ref)
        sumsq_ref[...] = jnp.zeros_like(sumsq_ref)

    x = x_ref[...].astype(jnp.float32)
    sum_ref[...] += jnp.sum(x, axis=0, keepdims=True)
    sumsq_ref[...] += jnp.sum(x * x, axis=0, keepdims=True)


def _bn_relu_conv_stats_kernel(H, x_ref, s1_ref, b1_ref, bw1_ref, sum_ref, sumsq_ref):
    """Pass 2: bn1 -> relu -> conv1; accumulate BN2 stats of z1 (z1 not written out)."""
    @pl.when(pl.program_id(0) == 0)
    def _init():
        sum_ref[...] = jnp.zeros_like(sum_ref)
        sumsq_ref[...] = jnp.zeros_like(sumsq_ref)

    x = x_ref[...].astype(jnp.float32)
    y = jnp.maximum(x * s1_ref[...] + b1_ref[...], 0.0)
    z = _conv3x3(y, bw1_ref, H)
    sum_ref[...] += jnp.sum(z, axis=0, keepdims=True)
    sumsq_ref[...] += jnp.sum(z * z, axis=0, keepdims=True)


def _residual_kernel(H, x_ref, s1_ref, b1_ref, bw1_ref, s2_ref, b2_ref, bw2_ref, o_ref):
    """Pass 3: recompute conv1, then bn2 -> relu -> conv2 -> + x (parallel over blocks)."""
    x = x_ref[...].astype(jnp.float32)
    y1 = jnp.maximum(x * s1_ref[...] + b1_ref[...], 0.0)
    z1 = _conv3x3(y1, bw1_ref, H)
    y2 = jnp.maximum(z1 * s2_ref[...] + b2_ref[...], 0.0)
    z2 = _conv3x3(y2, bw2_ref, H)
    o_ref[...] = (z2 + x).astype(o_ref.dtype)


# ---------------------------------------------------------------------------
# Wrappers
# ---------------------------------------------------------------------------

def residual_block_nhwc(x_nhwc, g1, b1, w1_oihw, g2, b2, w2_oihw,
                        *, matmul_dtype=jnp.bfloat16):
    """Pallas ResidualBlock forward on NHWC activations (no layout transposes, no upcast)."""
    N, H, W, C = x_nhwc.shape
    WC = W * C
    count = float(N * H * W)
    x2d = x_nhwc.reshape(N * H, WC)            # pure view, caller dtype kept in HBM

    bw1 = _band_weights(w1_oihw, W).astype(matmul_dtype)
    bw2 = _band_weights(w2_oihw, W).astype(matmul_dtype)

    TB = _pick_tb(N, H, WC)
    rows = TB * H
    grid = (N // TB,)

    row_spec = pl.BlockSpec((rows, WC), lambda i: (i, 0))
    vec_spec = pl.BlockSpec((1, WC), lambda i: (0, 0))
    bw_spec = pl.BlockSpec((3, WC, WC), lambda i: (0, 0, 0))

    cp_reduce = pltpu.CompilerParams(dimension_semantics=("arbitrary",),
                                     vmem_limit_bytes=VMEM_LIMIT)
    cp_parallel = pltpu.CompilerParams(dimension_semantics=("parallel",),
                                       vmem_limit_bytes=VMEM_LIMIT)

    # ---- pass 1: BN1 batch statistics of x ---------------------------------
    sum1, sumsq1 = pl.pallas_call(
        _stats_kernel,
        out_shape=(jax.ShapeDtypeStruct((1, WC), jnp.float32),
                   jax.ShapeDtypeStruct((1, WC), jnp.float32)),
        grid=grid,
        in_specs=[row_spec],
        out_specs=(vec_spec, vec_spec),
        compiler_params=cp_reduce,
    )(x2d)
    scale1, bias1 = _bn_affine_lane(sum1, sumsq1, g1, b1, W, C, count)

    # ---- pass 2: bn1 -> relu -> conv1 (+ BN2 stats of z1, z1 not stored) ----
    sum2, sumsq2 = pl.pallas_call(
        functools.partial(_bn_relu_conv_stats_kernel, H),
        out_shape=(jax.ShapeDtypeStruct((1, WC), jnp.float32),
                   jax.ShapeDtypeStruct((1, WC), jnp.float32)),
        grid=grid,
        in_specs=[row_spec, vec_spec, vec_spec, bw_spec],
        out_specs=(vec_spec, vec_spec),
        compiler_params=cp_reduce,
    )(x2d, scale1, bias1, bw1)
    scale2, bias2 = _bn_affine_lane(sum2, sumsq2, g2, b2, W, C, count)

    # ---- pass 3: (recomputed) conv1 -> bn2 -> relu -> conv2 -> + x ----------
    out2d = pl.pallas_call(
        functools.partial(_residual_kernel, H),
        out_shape=jax.ShapeDtypeStruct((N * H, WC), x_nhwc.dtype),
        grid=grid,
        in_specs=[row_spec, vec_spec, vec_spec, bw_spec,
                  vec_spec, vec_spec, bw_spec],
        out_specs=row_spec,
        compiler_params=cp_parallel,
    )(x2d, scale1, bias1, bw1, scale2, bias2, bw2)

    return out2d.reshape(N, H, W, C)


def residual_block(x_nchw, g1, b1, w1, g2, b2, w2, *, matmul_dtype=jnp.bfloat16):
    """PyTorch-convention (NCHW) wrapper.

    NOTE(perf): in production keep activations NHWC end-to-end and call
    residual_block_nhwc directly — these two transposes are HBM round trips that
    can rival the kernel cost at small C.
    """
    x_nhwc = jnp.transpose(x_nchw, (0, 2, 3, 1))
    out = residual_block_nhwc(x_nhwc, g1, b1, w1, g2, b2, w2,
                              matmul_dtype=matmul_dtype)
    return jnp.transpose(out, (0, 3, 1, 2))


# ---------------------------------------------------------------------------
# Pure-JAX reference (matches the PyTorch module, training-mode BN)
# ---------------------------------------------------------------------------

def _ref_forward(x, g1, b1, w1, g2, b2, w2):
    def bn_relu(v, g, b):
        mean = jnp.mean(v, axis=(0, 2, 3), keepdims=True)
        var = jnp.mean((v - mean) ** 2, axis=(0, 2, 3), keepdims=True)
        y = (v - mean) * lax.rsqrt(var + EPS) * g.reshape(1, -1, 1, 1) \
            + b.reshape(1, -1, 1, 1)
        return jnp.maximum(y, 0.0)

    def conv(v, w):
        return lax.conv_general_dilated(
            v, w, window_strides=(1, 1), padding=((1, 1), (1, 1)),
            dimension_numbers=('NCHW', 'OIHW', 'NCHW'))

    out = conv(bn_relu(x, g1, b1), w1)
    out = conv(bn_relu(out, g2, b2), w2)
    return out + x


if __name__ == "__main__":
    N, C, H, W = 2, 4, 16, 16
    keys = jax.random.split(jax.random.PRNGKey(0), 7)

    x = jax.random.normal(keys[0], (N, C, H, W), jnp.float32)
    w1 = 0.1 * jax.random.normal(keys[1], (C, C, 3, 3), jnp.float32)   # OIHW
    w2 = 0.1 * jax.random.normal(keys[2], (C, C, 3, 3), jnp.float32)
    g1 = 1.0 + 0.1 * jax.random.normal(keys[3], (C,), jnp.float32)
    b1 = 0.1 * jax.random.normal(keys[4], (C,), jnp.float32)
    g2 = 1.0 + 0.1 * jax.random.normal(keys[5], (C,), jnp.float32)
    b2 = 0.1 * jax.random.normal(keys[6], (C,), jnp.float32)

    ref = _ref_forward(x, g1, b1, w1, g2, b2, w2)

    # Exact-parity path: f32 MXU operands.
    out_f32 = jax.block_until_ready(
        residual_block(x, g1, b1, w1, g2, b2, w2, matmul_dtype=jnp.float32))
    np.testing.assert_allclose(np.asarray(out_f32), np.asarray(ref),
                               rtol=5e-4, atol=1e-4)

    # Default fast path: bf16 MXU operands with f32 accumulation (BN/ReLU/residual in f32).
    out_bf16 = jax.block_until_ready(residual_block(x, g1, b1, w1, g2, b2, w2))
    np.testing.assert_allclose(np.asarray(out_bf16), np.asarray(ref),
                               rtol=5e-2, atol=5e-2)

    print("KERNEL_OK")
</pallas_src>

<mosaic_0001>
module attributes {stable_mosaic.version = 11 : i64} {
  func.func @_stats_kernel(%arg0: i32, %arg1: memref<32x64xf32, #tpu.memory_space<vmem>>, %arg2: memref<1x64xf32, #tpu.memory_space<vmem>>, %arg3: memref<1x64xf32, #tpu.memory_space<vmem>>) attributes {dimension_semantics = [#tpu.dimension_semantics<arbitrary>], iteration_bounds = array<i64: 1>, scalar_prefetch = 0 : i64, scratch_operands = 0 : i64, tpu.core_type = #tpu.core_type<tc>, window_params = [{transform_indices = @transform_0, window_bounds = array<i64: 32, 64>}, {pipeline_mode = #tpu.pipeline_mode<synchronous>, transform_indices = @transform_1, window_bounds = array<i64: 1, 64>}, {pipeline_mode = #tpu.pipeline_mode<synchronous>, transform_indices = @transform_2, window_bounds = array<i64: 1, 64>}]} {
    %c0_i32 = arith.constant 0 : i32
    %0 = arith.cmpi eq, %arg0, %c0_i32 : i32
    %1 = arith.extui %0 : i1 to i32
    %c0_i32_0 = arith.constant 0 : i32
    %2 = arith.cmpi ne, %1, %c0_i32_0 : i32
    scf.if %2 {
      %cst_11 = arith.constant 0.000000e+00 : f32
      %15 = vector.broadcast %cst_11 : f32 to vector<1x64xf32>
      %c0_12 = arith.constant 0 : index
      %c0_13 = arith.constant 0 : index
      %16 = vector.load %arg2[%c0_12, %c0_13] : memref<1x64xf32, #tpu.memory_space<vmem>>, vector<1x64xf32>
      tpu.vector_store %arg2[%c0_12, %c0_13], %15 {strides = array<i32>} : memref<1x64xf32, #tpu.memory_space<vmem>>, vector<1x64xf32>,
      %cst_14 = arith.constant 0.000000e+00 : f32
      %17 = vector.broadcast %cst_14 : f32 to vector<1x64xf32>
      %c0_15 = arith.constant 0 : index
      %c0_16 = arith.constant 0 : index
      %18 = vector.load %arg3[%c0_15, %c0_16] : memref<1x64xf32, #tpu.memory_space<vmem>>, vector<1x64xf32>
      tpu.vector_store %arg3[%c0_15, %c0_16], %17 {strides = array<i32>} : memref<1x64xf32, #tpu.memory_space<vmem>>, vector<1x64xf32>,
    } else {
    }
    %c0 = arith.constant 0 : index
    %c0_1 = arith.constant 0 : index
    %3 = vector.load %arg1[%c0, %c0_1] : memref<32x64xf32, #tpu.memory_space<vmem>>, vector<32x64xf32>
    %c0_2 = arith.constant 0 : index
    %c0_3 = arith.constant 0 : index
    %4 = vector.load %arg2[%c0_2, %c0_3] : memref<1x64xf32, #tpu.memory_space<vmem>>, vector<1x64xf32>
    %cst = arith.constant dense<0.000000e+00> : vector<64xf32>
    %5 = vector.multi_reduction <add>, %3, %cst [0] : vector<32x64xf32> to vector<64xf32>
    %6 = vector.shape_cast %5 : vector<64xf32> to vector<1x64xf32>
    %7 = arith.addf %4, %6 : vector<1x64xf32>
    %c0_4 = arith.constant 0 : index
    %c0_5 = arith.constant 0 : index
    %8 = vector.load %arg2[%c0_4, %c0_5] : memref<1x64xf32, #tpu.memory_space<vmem>>, vector<1x64xf32>
    tpu.vector_store %arg2[%c0_4, %c0_5], %7 {strides = array<i32>} : memref<1x64xf32, #tpu.memory_space<vmem>>, vector<1x64xf32>,
    %c0_6 = arith.constant 0 : index
    %c0_7 = arith.constant 0 : index
    %9 = vector.load %arg3[%c0_6, %c0_7] : memref<1x64xf32, #tpu.memory_space<vmem>>, vector<1x64xf32>
    %10 = arith.mulf %3, %3 : vector<32x64xf32>
    %cst_8 = arith.constant dense<0.000000e+00> : vector<64xf32>
    %11 = vector.multi_reduction <add>, %10, %cst_8 [0] : vector<32x64xf32> to vector<64xf32>
    %12 = vector.shape_cast %11 : vector<64xf32> to vector<1x64xf32>
    %13 = arith.addf %9, %12 : vector<1x64xf32>
    %c0_9 = arith.constant 0 : index
    %c0_10 = arith.constant 0 : index
    %14 = vector.load %arg3[%c0_9, %c0_10] : memref<1x64xf32, #tpu.memory_space<vmem>>, vector<1x64xf32>
    tpu.vector_store %arg3[%c0_9, %c0_10], %13 {strides = array<i32>} : memref<1x64xf32, #tpu.memory_space<vmem>>, vector<1x64xf32>,
    return
  }
  func.func @transform_0(%arg0: i32) -> (i32, i32) {
    %c0_i32 = arith.constant 0 : i32
    %c0_i32_0 = arith.constant 0 : i32
    return %arg0, %c0_i32 : i32, i32
  }
  func.func @transform_1(%arg0: i32) -> (i32, i32) {
    %c0_i32 = arith.constant 0 : i32
    %c0_i32_0 = arith.constant 0 : i32
    %c0_i32_1 = arith.constant 0 : i32
    return %c0_i32, %c0_i32_0 : i32, i32
  }
  func.func @transform_2(%arg0: i32) -> (i32, i32) {
    %c0_i32 = arith.constant 0 : i32
    %c0_i32_0 = arith.constant 0 : i32
    %c0_i32_1 = arith.constant 0 : i32
    return %c0_i32, %c0_i32_0 : i32, i32
  }
}

</mosaic_0001>

<bundles_post_ra>
// kernel: tpu_custom_call.1
= control target key start
LH: loop header
LB: loop body
LE: loop exit
PB: predicated region body
PF: predicated region fallthrough
CT: control target
= control target key end

     0   :  { %8 = vsyncpa [#allocation3], 0  ;;  %s218_s0 = inlined_call_operand.hbm [shape: f32[32,64], index: 0, kind: input, shape index: {}]   ;;  %s219_s1 = inlined_call_operand.hbm [shape: f32[1,64], index: 1, kind: output, shape index: {0}]   ;;  %s220_s2 = inlined_call_operand.hbm [shape: f32[1,64], index: 2, kind: output, shape index: {1}]  }
   0x1   :  { %9 = vsyncpa [#allocation4], 0 }
   0x2   :  { %10 = vsyncpa [#allocation7], 0  ;;  %s176_s9 = smov [#allocation2]  }
   0x3   :  { %s16_s10 = sshll.u32 %s176_s9, 4  ;;  %s17_s10 = int_to_ptr.vmem [resolvable:$true] %s16_s10 }
   0x4   :  { %s118_s11 = scalar_lea.vmem %s17_s10, 512  ;;  %p123_p1 = scmp.lt.s32.totalorder %s17_s10, %s17_s10 }
   0x5   :  { %p119_p0 = scmp.ne.s32.totalorder %s17_s10, %s118_s11  ;;  %p124_p2 = scmp.lt.s32.totalorder %s118_s11, %s118_s11 }
   0x7   :  { %p125_p3 = por %p124_p2, %p123_p1 }
   0x9   :  { %p126_p4 = pnand %p125_p3, %p119_p0 }
   0xb   :  { %129 = shalt.err (!%p126_p4)
}
   0xc   :  { %s177_s12 = smov 128   ;;  %s178_s13 = smov 8  }
   0xd   :  { %22 = dma.hbm_to_vmem [thread:$0]  %s218_s0, 512, %s17_s10, [#allocation3], %s177_s12, %s177_s12, %s178_s13  }
   0xe   :  { %170 = dma.done.wait [#allocation3], 512  }
   0xf   :  { %171 = vsyncadd [#allocation3], 4294966784  ;;  %vm30_vm0 = vcmask 516096   ;;  %v179_v0 = vmov 0.0   ;;  %vm38_vm1 = vcmask 523264   ;;  %v33_v1 = vld [vmem:[#allocation2] sm:$0xff] }
  0x10   :  { %31 = vst.msk [vmem:[#allocation5] sm:$0x1] %vm30_vm0, %v179_v0  ;;  %32 = vst.msk [vmem:[#allocation6] sm:$0x1] %vm30_vm0, %v179_v0  ;;  %v34_v2 = vld [vmem:[#allocation2 + $0x8] sm:$0xff]  ;;  %v35_v3 = vld [vmem:[#allocation2 + $0x10] sm:$0xff]  ;;  %v56_v8 = vmul.f32 %v33_v1, %v33_v1 }
  0x11   :  { %v36_v4 = vld [vmem:[#allocation2 + $0x18] sm:$0xff]  ;;  %v39_v5 = vsel %vm38_vm1, %v33_v1, 0.0  ;;  %v40_v6 = vsel %vm38_vm1, %v34_v2, 0.0  ;;  %v42_v7 = vsel %vm38_vm1, %v35_v3, 0.0  ;;  %v57_v10 = vmul.f32 %v34_v2, %v34_v2  ;;  %s180_s0 = smov [#allocation5]   ;;  %s181_s17 = smov [#allocation6]  }
  0x12   :  { %v41_v9 = vadd.f32 %v40_v6, %v39_v5  ;;  %v58_v11 = vmul.f32 %v35_v3, %v35_v3  ;;  %v44_v12 = vsel %vm38_vm1, %v36_v4, 0.0  ;;  %v59_v13 = vmul.f32 %v36_v4, %v36_v4  ;;  %s81_s16 = sshll.u32 %s180_s0, 4  ;;  %s91_s18 = sshll.u32 %s181_s17, 4  ;;  %s82_s16 = int_to_ptr.vmem [resolvable:$true] %s81_s16  ;;  %s92_s18 = int_to_ptr.vmem [resolvable:$true] %s91_s18 }
  0x13   :  { %v60_v14 = vsel %vm38_vm1, %v56_v8, 0.0  ;;  %v61_v16 = vsel %vm38_vm1, %v57_v10, 0.0  ;;  %s130_s19 = scalar_lea.vmem %s82_s16, 16  ;;  %s134_s20 = scalar_lea.vmem %s82_s16, 32 }
  0x14   :  { %v43_v15 = vadd.f32 %v42_v7, %v41_v9  ;;  %v63_v17 = vsel %vm38_vm1, %v58_v11, 0.0  ;;  %v62_v18 = vadd.f32 %v61_v16, %v60_v14  ;;  %v65_v20 = vsel %vm38_vm1, %v59_v13, 0.0  ;;  %p131_p5 = scmp.ne.s32.totalorder %s82_s16, %s130_s19  ;;  %p135_p6 = scmp.lt.s32.totalorder %s82_s16, %s82_s16 }
  0x15   :  { %p136_p7 = scmp.lt.s32.totalorder %s134_s20, %s130_s19 }
  0x16   :  { %v45_v19 = vadd.f32 %v44_v12, %v43_v15  ;;  %v64_v21 = vadd.f32 %v63_v17, %v62_v18 }
  0x17   :  { %v37_v31 = vld [vmem:[#allocation5] sm:$0x1]  ;;  %v55_v36 = vld [vmem:[#allocation6] sm:$0x1]  ;;  %p137_p8 = por %p136_p7, %p135_p6 }
  0x18   :  { %v46_v22 = vrot.slane %v45_v19, 4  ;;  %v66_v23 = vadd.f32 %v65_v20, %v64_v21 }
  0x19   :  { %p138_p9 = pnand %p137_p8, %p131_p5 }
  0x1a   :  { %v47_v24 = vadd.f32 %v46_v22, %v45_v19  ;;  %v67_v25 = vrot.slane %v66_v23, 4 }
  0x1c   :  { %v48_v26 = vrot.slane %v47_v24, 2  ;;  %v68_v27 = vadd.f32 %v67_v25, %v66_v23 }
  0x1e   :  { %v49_v28 = vadd.f32 %v48_v26, %v47_v24  ;;  %v69_v29 = vrot.slane %v68_v27, 2 }
  0x20   :  { %v50_v30 = vrot.slane %v49_v28, 1  ;;  %v70_v32 = vadd.f32 %v69_v29, %v68_v27 }
  0x22   :  { %v51_v33 = vadd.f32 %v50_v30, %v49_v28  ;;  %v71_v34 = vrot.slane %v70_v32, 1 }
  0x24   :  { %v52_v35 = vadd.f32 %v51_v33, %v37_v31  ;;  %v72_v37 = vadd.f32 %v71_v34, %v70_v32 }
  0x26   :  { %54 = vst.msk [vmem:[#allocation5] sm:$0x1] %vm30_vm0, %v52_v35  ;;  %v73_v38 = vadd.f32 %v72_v37, %v55_v36 }
  0x27   :  { %141 = shalt.err (!%p138_p9)
}
  0x28   :  { %84 = dma.vmem_to_hbm [thread:$0]  %s82_s16, 16, %s219_s1, [#allocation4]   ;;  %74 = vst.msk [vmem:[#allocation6] sm:$0x1] %vm30_vm0, %v73_v38 }
  0x29   :  { %s150_s23 = scalar_lea.vmem %s92_s18, 16  ;;  %s154_s24 = scalar_lea.vmem %s92_s18, 32 }
  0x2a   :  { %p151_p10 = scmp.ne.s32.totalorder %s92_s18, %s150_s23  ;;  %p155_p11 = scmp.lt.s32.totalorder %s92_s18, %s92_s18 }
  0x2b   :  { %p156_p12 = scmp.lt.s32.totalorder %s154_s24, %s150_s23 }
  0x2d   :  { %p157_p13 = por %p156_p12, %p155_p11 }
  0x2f   :  { %p158_p0 = pnand %p157_p13, %p151_p10 }
  0x31   :  { %161 = shalt.err (!%p158_p0)
}
  0x32   :  { %94 = dma.vmem_to_hbm [thread:$0]  %s92_s18, 16, %s220_s2, [#allocation7]  }
  0x33   :  { %172 = dma.done.wait [#allocation4], 16  }
  0x34   :  { %173 = vsyncadd [#allocation4], 4294967280 }
  0x35   :  { %174 = dma.done.wait [#allocation7], 16  }
  0x36   :  { %175 = vsyncadd [#allocation7], 4294967280 }
  0x37   :  { %101 = vsyncpa [#allocation3], 1 }
  0x38   :  { %102 = vsyncpa [#allocation4], 1 }
  0x39   :  { %103 = vsyncpa [#allocation7], 1 }

</bundles_post_ra>
